<compile_context>
chip_gen: v7x
topology: tpu7x:2x2x1
jax: 0.10.0
libtpu: 0.0.40
codegen_flags: <defaults>
</compile_context>

<pallas_src>
import jax
import jax.numpy as jnp
from jax.experimental import pallas as pl
from jax.experimental.pallas import tpu as pltpu

ALPHA = 0.05
LANE = 128            # vreg lane width (last dim)
SUBLANE = 8           # vreg sublane count (second-last dim)
NCORES = 2            # parallel grid axis: 2 TCs on v7x, serialized elsewhere
MAX_BLOCK_ROWS = 2048  # 2048*128*4B = 1 MiB per f32 input block (0.5 MiB bf16)
ROW_ALIGN = 16        # block rows aligned for both 32-bit and 16-bit dtypes


def _cdiv(a, b):
    return -(-a // b)


def _round_up(a, b):
    return _cdiv(a, b) * b


def _loss_kernel(o_ref, t_ref, acc_ref):
    """Accumulate sum((t - o)^2 * (tanh(t) + alpha)) of this (block_rows, 128)
    block into a per-core (8, 128) accumulator.  The accumulator is the output
    block itself, which stays resident in VMEM across the 'arbitrary' axis."""
    i = pl.program_id(1)  # reduction axis

    @pl.when(i == 0)
    def _():
        acc_ref[...] = jnp.zeros_like(acc_ref)

    o = o_ref[...].astype(jnp.float32)
    t = t_ref[...].astype(jnp.float32)
    d = t - o
    val = d * d * (jnp.tanh(t) + jnp.float32(ALPHA))
    # Reduce the block only down to one vreg-shaped (8, 128) partial: the
    # reshape respects (8, 128) tile boundaries (layout no-op) and the axis-0
    # sum is pure VPU vector adds -- no per-step cross-lane / scalar reduce.
    acc_ref[...] += jnp.sum(val.reshape(-1, SUBLANE, LANE), axis=0)


def custom_mse(outputs, targets):
    """JAX/Pallas equivalent of CustomMSE.forward(outputs, targets).

    The effective computation is purely elementwise + a global mean, so both
    tensors are flattened (in their native dtype, no wrapper-side cast) to a
    lane-dense (rows, 128) slab.  Zero padding, when needed, is exact because
    (0-0)^2 * (tanh(0)+alpha) == 0.
    """
    assert outputs.shape == targets.shape
    n = int(outputs.size)
    assert n > 0

    o = outputs.reshape(-1)   # native dtype; f32 cast happens inside the kernel
    t = targets.reshape(-1)

    rows = _cdiv(n, LANE)
    block_rows = min(MAX_BLOCK_ROWS,
                     _round_up(_cdiv(rows, NCORES), ROW_ALIGN))
    steps = _cdiv(rows, NCORES * block_rows)
    rows_total = NCORES * steps * block_rows
    total = rows_total * LANE

    if total != n:
        # Only hit when the flattened size does not already tile; the module's
        # natural sizes (multiples of 75*8*256*256) need no padding at all.
        o = jnp.pad(o, (0, total - n))
        t = jnp.pad(t, (0, total - n))

    o2 = o.reshape(rows_total, LANE)
    t2 = t.reshape(rows_total, LANE)

    def in_map(c, i):
        return (c * steps + i, 0)

    partials = pl.pallas_call(
        _loss_kernel,
        out_shape=jax.ShapeDtypeStruct((NCORES * SUBLANE, LANE), jnp.float32),
        grid_spec=pltpu.PrefetchScalarGridSpec(
            num_scalar_prefetch=0,
            grid=(NCORES, steps),
            in_specs=[
                pl.BlockSpec((block_rows, LANE), in_map),
                pl.BlockSpec((block_rows, LANE), in_map),
            ],
            # One (8,128) accumulator slot per core; index only depends on the
            # parallel axis, so it is resident across the reduction axis.
            out_specs=pl.BlockSpec((SUBLANE, LANE), lambda c, i: (c, 0)),
        ),
        compiler_params=pltpu.CompilerParams(
            dimension_semantics=("parallel", "arbitrary"),
        ),
    )(o2, t2)

    # Tiny finalization (sum over (16,128) + divide) outside the kernel.
    return jnp.sum(partials) * jnp.float32(1.0 / n)


def _reference(outputs, targets):
    o = outputs.astype(jnp.float32)
    t = targets.astype(jnp.float32)
    return jnp.mean((t - o) ** 2 * (jnp.tanh(t) + ALPHA))


if __name__ == "__main__":
    key = jax.random.PRNGKey(0)
    k1, k2 = jax.random.split(key)
    # Small NCHW-shaped inputs (the module has no parameters).
    shape = (2, 4, 16, 16)
    outputs = jax.random.normal(k1, shape, dtype=jnp.float32)
    targets = jax.random.normal(k2, shape, dtype=jnp.float32)

    loss = jax.block_until_ready(custom_mse(outputs, targets))
    ref = jax.block_until_ready(_reference(outputs, targets))
    assert jnp.allclose(loss, ref, rtol=1e-5, atol=1e-6), (loss, ref)
    print("KERNEL_OK")
</pallas_src>

<mosaic_0001>
module attributes {stable_mosaic.version = 11 : i64} {
  func.func @_loss_kernel(%arg0: i32, %arg1: i32, %arg2: memref<16x128xf32, #tpu.memory_space<vmem>>, %arg3: memref<16x128xf32, #tpu.memory_space<vmem>>, %arg4: memref<8x128xf32, #tpu.memory_space<vmem>>) attributes {dimension_semantics = [#tpu.dimension_semantics<parallel>, #tpu.dimension_semantics<arbitrary>], iteration_bounds = array<i64: 2, 1>, scalar_prefetch = 0 : i64, scratch_operands = 0 : i64, tpu.core_type = #tpu.core_type<tc>, window_params = [{transform_indices = @transform_0, window_bounds = array<i64: 16, 128>}, {transform_indices = @transform_1, window_bounds = array<i64: 16, 128>}, {transform_indices = @transform_2, window_bounds = array<i64: 8, 128>}]} {
    %c0_i32 = arith.constant 0 : i32
    %0 = arith.cmpi eq, %arg1, %c0_i32 : i32
    %1 = arith.extui %0 : i1 to i32
    %c0_i32_0 = arith.constant 0 : i32
    %2 = arith.cmpi ne, %1, %c0_i32_0 : i32
    scf.if %2 {
      %cst_9 = arith.constant 0.000000e+00 : f32
      %16 = vector.broadcast %cst_9 : f32 to vector<8x128xf32>
      %c0_10 = arith.constant 0 : index
      %c0_11 = arith.constant 0 : index
      %17 = vector.load %arg4[%c0_10, %c0_11] : memref<8x128xf32, #tpu.memory_space<vmem>>, vector<8x128xf32>
      tpu.vector_store %arg4[%c0_10, %c0_11], %16 {strides = array<i32>} : memref<8x128xf32, #tpu.memory_space<vmem>>, vector<8x128xf32>,
    } else {
    }
    %c0 = arith.constant 0 : index
    %c0_1 = arith.constant 0 : index
    %3 = vector.load %arg2[%c0, %c0_1] : memref<16x128xf32, #tpu.memory_space<vmem>>, vector<16x128xf32>
    %c0_2 = arith.constant 0 : index
    %c0_3 = arith.constant 0 : index
    %4 = vector.load %arg3[%c0_2, %c0_3] : memref<16x128xf32, #tpu.memory_space<vmem>>, vector<16x128xf32>
    %5 = arith.subf %4, %3 : vector<16x128xf32>
    %6 = arith.mulf %5, %5 : vector<16x128xf32>
    %7 = math.tanh %4 : vector<16x128xf32>
    %cst = arith.constant 5.000000e-02 : f32
    %8 = vector.broadcast %cst : f32 to vector<16x128xf32>
    %9 = arith.addf %7, %8 : vector<16x128xf32>
    %10 = arith.mulf %6, %9 : vector<16x128xf32>
    %c0_4 = arith.constant 0 : index
    %c0_5 = arith.constant 0 : index
    %11 = vector.load %arg4[%c0_4, %c0_5] : memref<8x128xf32, #tpu.memory_space<vmem>>, vector<8x128xf32>
    %12 = vector.shape_cast %10 : vector<16x128xf32> to vector<2x8x128xf32>
    %cst_6 = arith.constant dense<0.000000e+00> : vector<8x128xf32>
    %13 = vector.multi_reduction <add>, %12, %cst_6 [0] : vector<2x8x128xf32> to vector<8x128xf32>
    %14 = arith.addf %11, %13 : vector<8x128xf32>
    %c0_7 = arith.constant 0 : index
    %c0_8 = arith.constant 0 : index
    %15 = vector.load %arg4[%c0_7, %c0_8] : memref<8x128xf32, #tpu.memory_space<vmem>>, vector<8x128xf32>
    tpu.vector_store %arg4[%c0_7, %c0_8], %14 {strides = array<i32>} : memref<8x128xf32, #tpu.memory_space<vmem>>, vector<8x128xf32>,
    return
  }
  func.func @transform_0(%arg0: i32, %arg1: i32) -> (i32, i32) {
    %c1_i32 = arith.constant 1 : i32
    %0 = arith.muli %arg0, %c1_i32 : i32
    %1 = arith.addi %0, %arg1 : i32
    %c0_i32 = arith.constant 0 : i32
    %c0_i32_0 = arith.constant 0 : i32
    return %1, %c0_i32 : i32, i32
  }
  func.func @transform_1(%arg0: i32, %arg1: i32) -> (i32, i32) {
    %c1_i32 = arith.constant 1 : i32
    %0 = arith.muli %arg0, %c1_i32 : i32
    %1 = arith.addi %0, %arg1 : i32
    %c0_i32 = arith.constant 0 : i32
    %c0_i32_0 = arith.constant 0 : i32
    return %1, %c0_i32 : i32, i32
  }
  func.func @transform_2(%arg0: i32, %arg1: i32) -> (i32, i32) {
    %c0_i32 = arith.constant 0 : i32
    %c0_i32_0 = arith.constant 0 : i32
    return %arg0, %c0_i32 : i32, i32
  }
}

</mosaic_0001>

<bundles_post_ra>
// kernel: tpu_custom_call.1
= control target key start
LH: loop header
LB: loop body
LE: loop exit
PB: predicated region body
PF: predicated region fallthrough
CT: control target
= control target key end

     0   :  { %7 = vsyncpa [#allocation3], 0  ;;  %s861_s0 = inlined_call_operand.hbm [shape: f32[32,128], index: 0, kind: input, shape index: {}]   ;;  %s862_s1 = inlined_call_operand.hbm [shape: f32[32,128], index: 1, kind: input, shape index: {}]   ;;  %s863_s2 = inlined_call_operand.hbm [shape: f32[16,128], index: 2, kind: output, shape index: {}]  }
   0x1   :  { %9 = vsyncpa [#allocation3 + $0x1], 0 }
   0x2   :  { %10 = vsyncpa [#allocation6], 0 }
   0x3   :  { %12 = vsyncpa [#allocation6 + $0x1], 0 }
   0x4   :  { %13 = vsyncpa [#allocation4], 0 }
   0x5   :  { %15 = vsyncpa [#allocation4 + $0x1], 0  ;;  %s626_s9 = smov 0   ;;  %s628_s10 = smov 0  }
   0x6   :  { %s630_s11 = smov 0   ;;  %s632_s12 = smov 0  }
   0x7   :  { %s634_s13 = smov 0   ;;  %s636_s14 = smov 0  }
   0x8 LB: > { %s364_s15 = sadd.s32 4294967295, %s604_s14   ;;  %s365_s16 = sadd.s32 4294967294, %s604_s14   ;;  %s604_s14 = sphi %s636_s14, %s21_s14   ;;  %s600_s13 = sphi %s634_s13, %s881_s13   ;;  %s596_s12 = sphi %s632_s12, %s880_s12   ;;  %s592_s11 = sphi %s630_s11, %s879_s11   ;;  %s588_s10 = sphi %s628_s10, %s878_s10   ;;  %s584_s9 = sphi %s626_s9, %s877_s9  }
   0x9   : > { %s33_s17 = sadd.s32 1, %s600_s13  ;;  %s42_s18 = sadd.s32 1, %s592_s11 }
   0xa   : > { %p35_p0 = scmp.ge.s32.totalorder %s33_s17, 2  ;;  %p49_p1 = scmp.ne.s32.totalorder %s592_s11, %s588_s10 }
   0xb   : > { %p50_p2 = scmp.eq.s32.totalorder %s604_s14, 0  ;;  %p55_p3 = scmp.ne.s32.totalorder %s588_s10, %s584_s9 }
   0xc   : > { %s883_s17 = smov (%p35_p0, %s33_s17), 0  ;;  %p56_p5 = scmp.eq.s32.totalorder %s364_s15, 0 }
   0xd   : > { %p667_p4 = por %p50_p2, %p49_p1  ;;  %s39_s20 = ssub.s32 %s600_s13, %s883_s17 }
   0xe   : > { %p107_p6 = scmp.eq.s32.totalorder %s364_s15, 1  ;;  %p40_p7 = scmp.eq.s32.totalorder %s39_s20, 0 }
   0xf   : > { %p673_p8 = por %p56_p5, %p55_p3  ;;  %p113_p10 = scmp.eq.s32.totalorder %s365_s16, 1 }
  0x10   : > { %p677_p9 = por %p107_p6, %p49_p1  ;;  %p401_p13 = scmp.lt.s32.totalorder %s604_s14, 2 }
  0x11   : > { %s867_s21 = scalar_select %p673_p8, 1, 0 }
  0x12   : > { %s868_s22 = scalar_select %p677_p9, 1, 0 }
  0x13   : > { %s682_s23 = scalar_select %p40_p7, %s592_s11, %s42_s18  }
  0x14   : > { %p684_p11 = por %p113_p10, %p55_p3  ;;  %s691_s25 = sand.u32 1, %s592_s11  }
  0x15   : > { %s368_s26 = sshll.u32 %s691_s25, 4  ;;  %s382_s27 = sshll.u32 %s600_s13, 8 }
  0x16   : > { %s869_s24 = scalar_select %p684_p11, 1, 0 }
  0x17   : > { %s700_s30 = scalar_lea.hbm %s861_s0, %s382_s27  ;;  %s137_s3 = scalar_lea.vmem [#allocation2], %s368_s26 }
  0x18   : > { %s145_s4 = sshll.u32 %s137_s3, 4  ;;  %p708_p0 = pnand %p401_p13, %p667_p4  ;;  %s704_s4 = int_to_ptr.vmem [resolvable:$true] %s145_s4 }
  0x19   : > { %s134_s6 = scalar_lea.sflag [#allocation3], %s691_s25  ;;  %s458_s7 = scalar_lea.hbm %s700_s30, 256 }
  0x1a   : > { %p459_p2 = scmp.ne.s32.totalorder %s700_s30, %s458_s7  ;;  %p460_p3 = pneg %p708_p0 }
  0x1b   : > { %s463_s16 = scalar_lea.hbm %s861_s0, 512  ;;  %p464_p4 = scmp.lt.u32.totalorder %s700_s30, %s861_s0 }
  0x1c   : > { %p461_p5 = pnand %p460_p3, %p459_p2  ;;  %p465_p7 = scmp.lt.u32.totalorder %s463_s16, %s458_s7 }
  0x1d   : > { %p467_p13 = scmp.lt.u32.totalorder %s458_s7, %s700_s30 }
  0x1e   : > { %p462_p6 = pneg %p461_p5  ;;  %p466_p10 = por %p465_p7, %p464_p4 }
  0x20   : > { %p468_p12 = por %p467_p13, %p466_p10 }
  0x22   : > { %p469_p1 = pnand %p468_p12, %p462_p6 }
  0x24   : > { %472 = shalt.err (!%p469_p1)
}
  0x25   : > { %s473_s20 = scalar_lea.vmem %s704_s4, 256  ;;  %s606_s28 = smov [#allocation2]  }
  0x26   : > { %p474_p2 = scmp.ne.s32.totalorder %s704_s4, %s473_s20  ;;  %s478_s29 = sshll.u32 %s606_s28, 4  ;;  %s479_s29 = int_to_ptr.vmem [resolvable:$false] %s478_s29 }
  0x27   : > { %s480_s3 = scalar_lea.vmem %s479_s29, 512  ;;  %p481_p9 = scmp.lt.s32.totalorder %s704_s4, %s479_s29 }
  0x28   : > { %p476_p5 = pnand %p474_p2, %p460_p3  ;;  %p482_p4 = scmp.lt.s32.totalorder %s480_s3, %s473_s20 }
  0x2a   : > { %p477_p11 = pneg %p476_p5  ;;  %p483_p7 = por %p482_p4, %p481_p9 }
  0x2c   : > { %p484_p10 = pnand %p483_p7, %p477_p11 }
  0x2e   : > { %487 = shalt.err (!%p484_p10)
}
  0x2f   : > { %s607_s7 = smov 128   ;;  %s608_s8 = smov 8  }
  0x30   : > { %393 = dma.hbm_to_vmem [thread:$0]  (!%p708_p0), %s700_s30, 256, %s704_s4, %s134_s6, %s607_s7, %s607_s7, %s608_s8  }
  0x31   : > { %p175_p9 = scmp.lt.s32.totalorder %s604_s14, 3  ;;  %s750_s18 = scalar_lea.hbm %s862_s1, %s382_s27 }
  0x32   : > { %p871_p11 = scmp.ge.s32.totalorder %s604_s14, 1  ;;  %s159_s20 = scalar_lea.vmem [#allocation5], %s368_s26 }
  0x33   : > { %s167_s28 = sshll.u32 %s159_s20, 4  ;;  %s156_s30 = scalar_lea.sflag [#allocation6], %s691_s25  ;;  %s760_s28 = int_to_ptr.vmem [resolvable:$true] %s167_s28 }
  0x34   : > { %p754_p12 = pnand %p871_p11, %p175_p9  ;;  %s488_s4 = scalar_lea.hbm %s750_s18, 256 }
  0x35   : > { %p489_p1 = scmp.ne.s32.totalorder %s750_s18, %s488_s4  ;;  %s493_s29 = scalar_lea.hbm %s862_s1, 512 }
  0x36   : > { %p494_p2 = scmp.lt.u32.totalorder %s750_s18, %s862_s1  ;;  %p495_p5 = scmp.lt.u32.totalorder %s493_s29, %s488_s4 }
  0x37   : > { %p491_p6 = pnand %p489_p1, %p460_p3  ;;  %p497_p7 = scmp.lt.u32.totalorder %s488_s4, %s750_s18 }
  0x38   : > { %p496_p4 = por %p495_p5, %p494_p2 }
  0x39   : > { %p492_p13 = pneg %p491_p6 }
  0x3a   : > { %p498_p10 = por %p497_p7, %p496_p4 }
  0x3c   : > { %p499_p9 = pnand %p498_p10, %p492_p13 }
  0x3e   : > { %502 = shalt.err (!%p499_p9)
}
  0x3f   : > { %s503_s26 = scalar_lea.vmem %s760_s28, 256  ;;  %s609_s16 = smov [#allocation5]  }
  0x40   : > { %p504_p11 = scmp.ne.s32.totalorder %s760_s28, %s503_s26  ;;  %s508_s20 = sshll.u32 %s609_s16, 4  ;;  %s509_s20 = int_to_ptr.vmem [resolvable:$false] %s508_s20 }
  0x41   : > { %s510_s27 = scalar_lea.vmem %s509_s20, 512  ;;  %p511_p8 = scmp.lt.s32.totalorder %s760_s28, %s509_s20 }
  0x42   : > { %p506_p1 = pnand %p504_p11, %p460_p3  ;;  %p512_p2 = scmp.lt.s32.totalorder %s510_s27, %s503_s26 }
  0x44   : > { %p507_p6 = pneg %p506_p1  ;;  %p513_p5 = por %p512_p2, %p511_p8 }
  0x46   : > { %p514_p4 = pnand %p513_p5, %p507_p6 }
  0x48   : > { %517 = shalt.err (!%p514_p4)
}
  0x49   : > { %396 = dma.hbm_to_vmem [thread:$0]  (!%p708_p0), %s750_s18, 256, %s760_s28, %s156_s30, %s607_s7, %s607_s7, %s608_s8  }
  0x4a   : > { %179 = sbr.rel (%p754_p12) target bundleno = 117 (0x75), region = 28  ;;  %s794_s4 = sand.u32 (!%p754_p12), 1, %s588_s10  }
  0x4b   : > { %s375_s6 = sshll.u32 (!%p754_p12), %s794_s4, 4  ;;  %s182_s29 = scalar_lea.sflag (!%p754_p12), [#allocation3], %s794_s4 }
  0x4c   : > { %s185_s5 = scalar_lea.vmem (!%p754_p12), [#allocation2], %s375_s6  ;;  %p873_p8 = scmp.ne.s32.totalorder (!%p754_p12), %s867_s21, 0 }
  0x51   : > { %571 = dma.done.wait (%p873_p8), %s182_s29, 256  }
  0x52   : > { %573 = vsyncadd (%p873_p8), %s182_s29, 4294967040  ;;  %s191_s25 = scalar_lea.sflag [#allocation6], %s794_s4  ;;  %s194_s7 = scalar_lea.vmem [#allocation5], %s375_s6 }
  0x53   : > { %575 = dma.done.wait (%p873_p8), %s191_s25, 256  }
  0x54   : > { %577 = vsyncadd (%p873_p8), %s191_s25, 4294967040  ;;  %v231_v0 = vld [vmem:[%s194_s7] sm:$0xff]  ;;  %v232_v1 = vld [vmem:[%s194_s7 + $0x8] sm:$0xff]  ;;  %s377_s8 = sshll.u32 %s794_s4, 3  ;;  %s379_s21 = sshll.u32 %s596_s12, 7 }
  0x55   : > { %454 = vtanh.f32 %v231_v0  ;;  %v229_v2 = vld [vmem:[%s185_s5] sm:$0xff]  ;;  %v230_v3 = vld [vmem:[%s185_s5 + $0x8] sm:$0xff]  ;;  %s219_s18 = scalar_lea.vmem [#allocation7], %s377_s8  ;;  %s812_s3 = scalar_lea.hbm %s863_s2, %s379_s21 }
  0x56   : > { %456 = vtanh.f32 %v232_v1  ;;  %v233_v4 = vsub.f32 %v231_v0, %v229_v2  ;;  %v234_v5 = vsub.f32 %v232_v1, %v230_v3  ;;  %s261_s19 = sshll.u32 %s219_s18, 4  ;;  %s248_s15 = scalar_lea.sflag [#allocation4], %s794_s4  ;;  %s814_s19 = int_to_ptr.vmem [resolvable:$true] %s261_s19 }
  0x57   : > { %s518_s26 = scalar_lea.vmem %s814_s19, 128  ;;  %p874_p3 = scmp.ne.s32.totalorder %s868_s22, 0 }
  0x58   : > { %v235_v6 = vmul.f32 %v233_v4, %v233_v4  ;;  %v236_v8 = vmul.f32 %v234_v5, %v234_v5  ;;  %p519_p0 = scmp.ne.s32.totalorder %s814_s19, %s518_s26  ;;  %s610_s12 = smov [#allocation7]  }
  0x59   : > { %s522_s16 = sshll.u32 %s610_s12, 4  ;;  %s523_s16 = int_to_ptr.vmem [resolvable:$false] %s522_s16 }
  0x5a   : > { %p520_p12 = pnand %p519_p0, %p874_p3  ;;  %s524_s20 = scalar_lea.vmem %s523_s16, 256 }
  0x5b   : > { %p525_p7 = scmp.lt.s32.totalorder %s814_s19, %s523_s16  ;;  %p526_p10 = scmp.lt.s32.totalorder %s524_s20, %s518_s26 }
  0x5c   : > { %p521_p13 = pneg %p520_p12 }
  0x5d   : > { %p527_p9 = por %p526_p10, %p525_p7 }
  0x5f   : > { %v455_v7 = vpop.eup %454  ;;  %p528_p11 = pnand %p527_p9, %p521_p13 }
  0x60   : > { %v457_v9 = vpop.eup %456  ;;  %v239_v10 = vadd.f32 0.05, %v455_v7 }
  0x61   : > { %v240_v11 = vadd.f32 0.05, %v457_v9 }
  0x62   : > { %v241_v12 = vmul.f32 %v239_v10, %v235_v6 }
  0x63   : > { %v242_v13 = vmul.f32 %v240_v11, %v236_v8 }
  0x65   : > { %v244_v14 = vadd.f32 %v242_v13, %v241_v12 }
  0x67   : > { %246 = vst [vmem:[%s219_s18] sm:$0xff] %v244_v14 }
  0x68   : > { %531 = shalt.err (!%p528_p11)
}
  0x69   : > { %s532_s27 = scalar_lea.hbm %s812_s3, 128  ;;  %s536_s29 = scalar_lea.hbm %s863_s2, 256 }
  0x6a   : > { %p533_p1 = scmp.ne.s32.totalorder %s812_s3, %s532_s27  ;;  %p537_p5 = scmp.lt.u32.totalorder %s812_s3, %s863_s2 }
  0x6b   : > { %p538_p4 = scmp.lt.u32.totalorder %s536_s29, %s532_s27  ;;  %p540_p0 = scmp.lt.u32.totalorder %s532_s27, %s812_s3 }
  0x6c   : > { %p534_p6 = pnand %p533_p1, %p874_p3 }
  0x6d   : > { %p539_p8 = por %p538_p4, %p537_p5 }
  0x6e   : > { %p535_p2 = pneg %p534_p6 }
  0x6f   : > { %p541_p12 = por %p540_p0, %p539_p8 }
  0x71   : > { %p542_p13 = pnand %p541_p12, %p535_p2 }
  0x73   : > { %545 = shalt.err (!%p542_p13)
}
  0x74   : > { %388 = dma.vmem_to_hbm [thread:$0]  (%p874_p3), %s814_s19, 128, %s812_s3, %s248_s15  }
  0x75 PF: > { %s273_s7 = sand.u32 1, %s584_s9   ;;  %p875_p7 = scmp.ne.s32.totalorder %s869_s24, 0 }
  0x76   : > { %p876_p10 = scmp.ge.s32.totalorder %s604_s14, 2  ;;  %s274_s8 = scalar_lea.sflag [#allocation4], %s273_s7 }
  0x78   : > { %p398_p9 = pnand %p876_p10, %p875_p7 }
  0x7a   : > { %579 = dma.done.wait (!%p398_p9), %s274_s8, 128  }
  0x7b   : > { %581 = vsyncadd (!%p398_p9), %s274_s8, 4294967168  ;;  %s21_s14 = sadd.s32 1, %s604_s14   ;;  %s877_s9 = smov %s588_s10 }
  0x7c   : > { %p18_p11 = scmp.ge.s32.totalorder %s21_s14, 4   ;;  %s878_s10 = smov %s592_s11 }
  0x7d   : > { %s879_s11 = smov %s682_s23  ;;  %s880_s12 = smov %s600_s13 }
  0x7e   : > { %s881_s13 = smov %s883_s17  ;;  %20 = sbr.rel (!%p18_p11) target bundleno = 8 (0x8), region = 90 }
  0x85   :  { %279 = vsyncpa [#allocation3], 1 }
  0x86   :  { %281 = vsyncpa [#allocation3 + $0x1], 1 }
  0x87   :  { %282 = vsyncpa [#allocation6], 1 }
  0x88   :  { %284 = vsyncpa [#allocation6 + $0x1], 1 }
  0x89   :  { %285 = vsyncpa [#allocation4], 1 }
  0x8a   :  { %287 = vsyncpa [#allocation4 + $0x1], 1 }

</bundles_post_ra>
